<compile_context>
chip_gen: v5e
topology: v5e:2x2
jax: 0.10.0
libtpu: 0.0.40
codegen_flags: <defaults>
</compile_context>

<pallas_src>
import functools

import jax
import jax.numpy as jnp
from jax.experimental import pallas as pl
from jax.experimental.pallas import tpu as pltpu

HIDDEN = 128
BATCH_TILE = 256


def _critic_mid_kernel(x_ref, w_ref, b_ref, out_ref):
    """Whole critic MLP for one batch tile; all operands fit VMEM trivially."""
    h = x_ref[...]                                   # (tb, 128) bf16

    # Three hidden layers: bf16 x bf16 -> f32 MXU acc, f32 bias + relu, cast back.
    for layer in range(3):                           # static unroll
        w = w_ref[layer]                             # (128, 128) bf16, static index
        b = b_ref[pl.ds(layer, 1), :]                # (1, 128) f32, static slice
        h = jnp.dot(h, w, preferred_element_type=jnp.float32) + b
        h = jnp.maximum(h, 0.0).astype(jnp.bfloat16)

    # Q head (w4 zero-padded (128,1) -> (128,128); b4 likewise). Lane-dense store.
    q = jnp.dot(h, w_ref[3], preferred_element_type=jnp.float32) + b_ref[pl.ds(3, 1), :]
    out_ref[...] = q.astype(out_ref.dtype)           # (tb, 128) unmasked vst


def pack_params(params, in_dim, hidden=HIDDEN, weight_dtype=jnp.bfloat16):
    """One-time packing: 9 small tensors -> 2 DMA-friendly, lane/sublane-padded arrays."""
    D = hidden
    W = jnp.zeros((4, D, D), jnp.float32)
    W = W.at[0, :in_dim, :].set(params["w1"])        # pad sublane dim in_dim -> 128
    W = W.at[1].set(params["w2"])
    W = W.at[2].set(params["w3"])
    W = W.at[3, :, :1].set(params["w4"])             # pad lane dim 1 -> 128

    b = jnp.zeros((8, D), jnp.float32)               # sublane-padded 4 -> 8
    b = b.at[0].set(params["b1"][0])
    b = b.at[1].set(params["b2"][0])
    b = b.at[2].set(params["b3"][0])
    b = b.at[3, :1].set(params["b4"][0])

    return {"W": W.astype(weight_dtype), "b": b}


@functools.partial(jax.jit, static_argnames=("max_action",))
def critic_module_mid_forward(x, actions, packed, max_action):
    """Pallas forward pass for critic_module_mid.

    x:       (B, obs + goal) f32
    actions: (B, action)     f32
    packed:  dict from pack_params (W: (4,128,128) bf16, b: (8,128) f32)
    Returns  (B, 1) f32 Q-values.
    """
    B = x.shape[0]
    D = HIDDEN
    xin = jnp.concatenate([x, actions / max_action], axis=1)
    in_dim = xin.shape[1]

    # Batch padding / tiling: single 8-row tile for small RL batches, 256-row tiles
    # (grid over batch, weights resident across iterations) for large ones.
    B_pad = max(8, ((B + 7) // 8) * 8)
    if B_pad > BATCH_TILE:
        tb = BATCH_TILE
        B_pad = ((B_pad + tb - 1) // tb) * tb
    else:
        tb = B_pad
    x_pad = jnp.pad(xin.astype(jnp.bfloat16), ((0, B_pad - B), (0, D - in_dim)))

    out = pl.pallas_call(
        _critic_mid_kernel,
        out_shape=jax.ShapeDtypeStruct((B_pad, D), jnp.float32),
        grid=(B_pad // tb,),
        in_specs=[pl.BlockSpec((tb, D), lambda i: (i, 0)),
                  pl.BlockSpec((4, D, D), lambda i: (0, 0, 0)),   # resident weights
                  pl.BlockSpec((8, D), lambda i: (0, 0))],        # resident biases
        out_specs=pl.BlockSpec((tb, D), lambda i: (i, 0)),
        compiler_params=pltpu.CompilerParams(dimension_semantics=("parallel",)),
        # Advisory hint so XLA can overlap this tiny call inside larger RL graphs.
        cost_estimate=pl.CostEstimate(
            flops=2 * B_pad * D * D * 4,
            transcendentals=0,
            bytes_accessed=4 * D * D * 2 + 8 * D * 4 + B_pad * D * 2 + B_pad * D * 4,
        ),
    )(x_pad, packed["W"], packed["b"])
    return out[:B, :1]


def init_params(key, in_dim, hidden=HIDDEN):
    """Deterministic synthetic init (PyTorch nn.Linear-like uniform bounds)."""
    def linear(k, fan_in, fan_out):
        kw, kb = jax.random.split(k)
        bound = 1.0 / jnp.sqrt(jnp.float32(fan_in))
        w = jax.random.uniform(kw, (fan_in, fan_out), jnp.float32, -bound, bound)
        b = jax.random.uniform(kb, (1, fan_out), jnp.float32, -bound, bound)
        return w, b

    k1, k2, k3, k4 = jax.random.split(key, 4)
    w1, b1 = linear(k1, in_dim, hidden)
    w2, b2 = linear(k2, hidden, hidden)
    w3, b3 = linear(k3, hidden, hidden)
    w4, b4 = linear(k4, hidden, 1)
    return {"w1": w1, "b1": b1, "w2": w2, "b2": b2,
            "w3": w3, "b3": b3, "w4": w4, "b4": b4}


def reference_forward(x, actions, params, max_action, weight_dtype=jnp.bfloat16):
    """Pure-JAX reference with the same bf16 weight/activation rounding as the kernel."""
    f32 = lambda a: a.astype(jnp.float32)
    wd = lambda w: f32(w.astype(weight_dtype))
    bf = lambda a: f32(a.astype(jnp.bfloat16))

    h = jnp.concatenate([x, actions / max_action], axis=1)
    h = jnp.maximum(bf(h) @ wd(params["w1"]) + params["b1"], 0.0)
    h = jnp.maximum(bf(h) @ wd(params["w2"]) + params["b2"], 0.0)
    h = jnp.maximum(bf(h) @ wd(params["w3"]) + params["b3"], 0.0)
    return bf(h) @ wd(params["w4"]) + params["b4"]


if __name__ == "__main__":
    # env_params: obs=10, goal=3, action=4, action_max=2.0 ; batch=8
    obs_dim, goal_dim, action_dim = 10, 3, 4
    max_action = 2.0
    batch = 8
    in_dim = obs_dim + goal_dim + action_dim        # 17

    key = jax.random.PRNGKey(0)
    kx, ka, kp = jax.random.split(key, 3)
    x = jax.random.normal(kx, (batch, obs_dim + goal_dim), jnp.float32)
    actions = max_action * jax.random.uniform(ka, (batch, action_dim), jnp.float32, -1.0, 1.0)

    params = init_params(kp, in_dim)
    packed = pack_params(params, in_dim)            # one-time, outside the hot path

    q = critic_module_mid_forward(x, actions, packed, max_action)
    q = jax.block_until_ready(q)

    ref = reference_forward(x, actions, params, max_action)
    assert q.shape == (batch, 1)
    assert jnp.allclose(q, ref, atol=1e-4, rtol=1e-4), float(jnp.max(jnp.abs(q - ref)))

    print("KERNEL_OK")
</pallas_src>

<mosaic_0001>
module attributes {stable_mosaic.version = 11 : i64} {
  func.func @_critic_mid_kernel(%arg0: i32, %arg1: memref<8x128xbf16, #tpu.memory_space<vmem>>, %arg2: memref<4x128x128xbf16, #tpu.memory_space<vmem>>, %arg3: memref<8x128xf32, #tpu.memory_space<vmem>>, %arg4: memref<8x128xf32, #tpu.memory_space<vmem>>) attributes {dimension_semantics = [#tpu.dimension_semantics<parallel>], iteration_bounds = array<i64: 1>, scalar_prefetch = 0 : i64, scratch_operands = 0 : i64, tpu.core_type = #tpu.core_type<tc>, window_params = [{transform_indices = @transform_0, window_bounds = array<i64: 8, 128>}, {pipeline_mode = #tpu.pipeline_mode<synchronous>, transform_indices = @transform_1, window_bounds = array<i64: 4, 128, 128>}, {pipeline_mode = #tpu.pipeline_mode<synchronous>, transform_indices = @transform_2, window_bounds = array<i64: 8, 128>}, {transform_indices = @transform_3, window_bounds = array<i64: 8, 128>}]} {
    %c0 = arith.constant 0 : index
    %c0_0 = arith.constant 0 : index
    %0 = vector.load %arg1[%c0, %c0_0] : memref<8x128xbf16, #tpu.memory_space<vmem>>, vector<8x128xbf16>
    %c0_1 = arith.constant 0 : index
    %c0_2 = arith.constant 0 : index
    %c0_3 = arith.constant 0 : index
    %1 = vector.load %arg2[%c0_1, %c0_2, %c0_3] : memref<4x128x128xbf16, #tpu.memory_space<vmem>>, vector<1x128x128xbf16>
    %2 = vector.shape_cast %1 : vector<1x128x128xbf16> to vector<128x128xbf16>
    %c0_4 = arith.constant 0 : index
    %c0_5 = arith.constant 0 : index
    %3 = vector.load %arg3[%c0_4, %c0_5] : memref<8x128xf32, #tpu.memory_space<vmem>>, vector<1x128xf32>
    %cst = arith.constant dense<0.000000e+00> : vector<8x128xf32>
    %4 = tpu.matmul %0, %2, %cst {dimension_numbers = #tpu.dot_dimension_numbers<[1], [0], [0], [1], [0, 0, 1, 1], [], []>} : vector<8x128xbf16>, vector<128x128xbf16>, vector<8x128xf32> -> vector<8x128xf32>
    %5 = vector.broadcast %3 : vector<1x128xf32> to vector<8x128xf32>
    %6 = arith.addf %4, %5 : vector<8x128xf32>
    %cst_6 = arith.constant 0.000000e+00 : f32
    %7 = vector.broadcast %cst_6 : f32 to vector<8x128xf32>
    %8 = arith.maximumf %6, %7 : vector<8x128xf32>
    %9 = arith.truncf %8 : vector<8x128xf32> to vector<8x128xbf16>
    %c1 = arith.constant 1 : index
    %c0_7 = arith.constant 0 : index
    %c0_8 = arith.constant 0 : index
    %10 = vector.load %arg2[%c1, %c0_7, %c0_8] : memref<4x128x128xbf16, #tpu.memory_space<vmem>>, vector<1x128x128xbf16>
    %11 = vector.shape_cast %10 : vector<1x128x128xbf16> to vector<128x128xbf16>
    %c1_9 = arith.constant 1 : index
    %c0_10 = arith.constant 0 : index
    %12 = vector.load %arg3[%c1_9, %c0_10] : memref<8x128xf32, #tpu.memory_space<vmem>>, vector<1x128xf32>
    %cst_11 = arith.constant dense<0.000000e+00> : vector<8x128xf32>
    %13 = tpu.matmul %9, %11, %cst_11 {dimension_numbers = #tpu.dot_dimension_numbers<[1], [0], [0], [1], [0, 0, 1, 1], [], []>} : vector<8x128xbf16>, vector<128x128xbf16>, vector<8x128xf32> -> vector<8x128xf32>
    %14 = vector.broadcast %12 : vector<1x128xf32> to vector<8x128xf32>
    %15 = arith.addf %13, %14 : vector<8x128xf32>
    %cst_12 = arith.constant 0.000000e+00 : f32
    %16 = vector.broadcast %cst_12 : f32 to vector<8x128xf32>
    %17 = arith.maximumf %15, %16 : vector<8x128xf32>
    %18 = arith.truncf %17 : vector<8x128xf32> to vector<8x128xbf16>
    %c2 = arith.constant 2 : index
    %c0_13 = arith.constant 0 : index
    %c0_14 = arith.constant 0 : index
    %19 = vector.load %arg2[%c2, %c0_13, %c0_14] : memref<4x128x128xbf16, #tpu.memory_space<vmem>>, vector<1x128x128xbf16>
    %20 = vector.shape_cast %19 : vector<1x128x128xbf16> to vector<128x128xbf16>
    %c2_15 = arith.constant 2 : index
    %c0_16 = arith.constant 0 : index
    %21 = vector.load %arg3[%c2_15, %c0_16] : memref<8x128xf32, #tpu.memory_space<vmem>>, vector<1x128xf32>
    %cst_17 = arith.constant dense<0.000000e+00> : vector<8x128xf32>
    %22 = tpu.matmul %18, %20, %cst_17 {dimension_numbers = #tpu.dot_dimension_numbers<[1], [0], [0], [1], [0, 0, 1, 1], [], []>} : vector<8x128xbf16>, vector<128x128xbf16>, vector<8x128xf32> -> vector<8x128xf32>
    %23 = vector.broadcast %21 : vector<1x128xf32> to vector<8x128xf32>
    %24 = arith.addf %22, %23 : vector<8x128xf32>
    %cst_18 = arith.constant 0.000000e+00 : f32
    %25 = vector.broadcast %cst_18 : f32 to vector<8x128xf32>
    %26 = arith.maximumf %24, %25 : vector<8x128xf32>
    %27 = arith.truncf %26 : vector<8x128xf32> to vector<8x128xbf16>
    %c3 = arith.constant 3 : index
    %c0_19 = arith.constant 0 : index
    %c0_20 = arith.constant 0 : index
    %28 = vector.load %arg2[%c3, %c0_19, %c0_20] : memref<4x128x128xbf16, #tpu.memory_space<vmem>>, vector<1x128x128xbf16>
    %29 = vector.shape_cast %28 : vector<1x128x128xbf16> to vector<128x128xbf16>
    %cst_21 = arith.constant dense<0.000000e+00> : vector<8x128xf32>
    %30 = tpu.matmul %27, %29, %cst_21 {dimension_numbers = #tpu.dot_dimension_numbers<[1], [0], [0], [1], [0, 0, 1, 1], [], []>} : vector<8x128xbf16>, vector<128x128xbf16>, vector<8x128xf32> -> vector<8x128xf32>
    %c3_22 = arith.constant 3 : index
    %c0_23 = arith.constant 0 : index
    %31 = vector.load %arg3[%c3_22, %c0_23] : memref<8x128xf32, #tpu.memory_space<vmem>>, vector<1x128xf32>
    %32 = vector.broadcast %31 : vector<1x128xf32> to vector<8x128xf32>
    %33 = arith.addf %30, %32 : vector<8x128xf32>
    %c0_24 = arith.constant 0 : index
    %c0_25 = arith.constant 0 : index
    %34 = vector.load %arg4[%c0_24, %c0_25] : memref<8x128xf32, #tpu.memory_space<vmem>>, vector<8x128xf32>
    tpu.vector_store %arg4[%c0_24, %c0_25], %33 {strides = array<i32>} : memref<8x128xf32, #tpu.memory_space<vmem>>, vector<8x128xf32>,
    return
  }
  func.func @transform_0(%arg0: i32) -> (i32, i32) {
    %c0_i32 = arith.constant 0 : i32
    %c0_i32_0 = arith.constant 0 : i32
    return %arg0, %c0_i32 : i32, i32
  }
  func.func @transform_1(%arg0: i32) -> (i32, i32, i32) {
    %c0_i32 = arith.constant 0 : i32
    %c0_i32_0 = arith.constant 0 : i32
    %c0_i32_1 = arith.constant 0 : i32
    %c0_i32_2 = arith.constant 0 : i32
    return %c0_i32, %c0_i32_0, %c0_i32_1 : i32, i32, i32
  }
  func.func @transform_2(%arg0: i32) -> (i32, i32) {
    %c0_i32 = arith.constant 0 : i32
    %c0_i32_0 = arith.constant 0 : i32
    %c0_i32_1 = arith.constant 0 : i32
    return %c0_i32, %c0_i32_0 : i32, i32
  }
  func.func @transform_3(%arg0: i32) -> (i32, i32) {
    %c0_i32 = arith.constant 0 : i32
    %c0_i32_0 = arith.constant 0 : i32
    return %arg0, %c0_i32 : i32, i32
  }
}

</mosaic_0001>

<bundles_post_ra>
// kernel: critic_module_mid_forward.1
= control target key start
LH: loop header
LB: loop body
LE: loop exit
PB: predicated region body
PF: predicated region fallthrough
CT: control target
= control target key end

     0   :  { %8 = vsyncpa [#allocation3], 0  ;;  %s555_s15 = smov [#allocation2]   ;;  %s556_s17 = smov 64   ;;  %s599_s0 = inlined_call_operand.vmem [shape: bf16[8,128], index: 0, kind: input, shape index: {}]   ;;  %s600_s1 = inlined_call_operand.hbm [shape: bf16[4,128,128], index: 1, kind: input, shape index: {}]   ;;  %s601_s2 = inlined_call_operand.vmem [shape: f32[8,128], index: 2, kind: input, shape index: {}]   ;;  %s602_s3 = inlined_call_operand.vmem [shape: f32[8,128], index: 3, kind: output, shape index: {}]  }
   0x1   :  { %s15_s14 = sshll.u32 %s600_s1, 4  ;;  %s17_s16 = sshll.u32 %s555_s15, 4  ;;  %s16_s14 = int_to_ptr.hbm [resolvable:$true] %s15_s14  ;;  %s18_s16 = int_to_ptr.vmem [resolvable:$true] %s17_s16 }
   0x2   :  { %s557_s18 = smov 4  }
   0x3   :  { %23 = dma.hbm_to_vmem [thread:$0]  %s16_s14, 4096, %s18_s16, [#allocation3], %s556_s17, %s556_s17, %s557_s18  }
   0x4   :  { %553 = dma.done.wait [#allocation3], 4096  }
   0x5   :  { %554 = vsyncadd [#allocation3], 4294963200  ;;  %v497_v0 = vld [vmem:[#allocation2 + $0x38] sm:$0xff]  ;;  %v496_v1 = vld [vmem:[#allocation2 + $0x30] sm:$0xff] }
   0x6   :  { %97 = vmatpush.bf16.msra.mxu0 %v497_v0  ;;  %v505_v2 = vld [vmem:[#allocation2 + $0x78] sm:$0xff]  ;;  %v504_v3 = vld [vmem:[#allocation2 + $0x70] sm:$0xff]  ;;  %v495_v4 = vld [vmem:[#allocation2 + $0x28] sm:$0xff] }
   0x7   :  { %179 = vmatpush.bf16.msra.mxu1 %v505_v2  ;;  %v503_v5 = vld [vmem:[#allocation2 + $0x68] sm:$0xff]  ;;  %v494_v6 = vld [vmem:[#allocation2 + $0x20] sm:$0xff]  ;;  %v493_v8 = vld [vmem:[#allocation2 + $0x18] sm:$0xff] }
   0x8   :  { %v502_v7 = vld [vmem:[#allocation2 + $0x60] sm:$0xff]  ;;  %v501_v9 = vld [vmem:[#allocation2 + $0x58] sm:$0xff]  ;;  %v492_v10 = vld [vmem:[#allocation2 + $0x10] sm:$0xff] }
   0x9   :  { %v500_v11 = vld [vmem:[#allocation2 + $0x50] sm:$0xff]  ;;  %v491_v12 = vld [vmem:[#allocation2 + $0x8] sm:$0xff]  ;;  %v490_v13 = vld [vmem:[#allocation2] sm:$0xff] }
   0xa   :  { %98 = vmatpush.bf16.msra.mxu0 %v496_v1  ;;  %v30_v14 = vld [vmem:[%s599_s0] sm:$0xf]  ;;  %v499_v15 = vld [vmem:[#allocation2 + $0x48] sm:$0xff]  ;;  %v513_v17 = vld [vmem:[#allocation2 + $0xb8] sm:$0xff] }
   0xb   :  { %180 = vmatpush.bf16.msra.mxu1 %v504_v3  ;;  %v498_v16 = vld [vmem:[#allocation2 + $0x40] sm:$0xff]  ;;  %261 = vmatpush.bf16.msra.mxu2 %v513_v17  ;;  %v512_v18 = vld [vmem:[#allocation2 + $0xb0] sm:$0xff]  ;;  %v511_v19 = vld [vmem:[#allocation2 + $0xa8] sm:$0xff] }
   0xc   :  { %v510_v20 = vld [vmem:[#allocation2 + $0xa0] sm:$0xff]  ;;  %v509_v21 = vld [vmem:[#allocation2 + $0x98] sm:$0xff]  ;;  %v508_v22 = vld [vmem:[#allocation2 + $0x90] sm:$0xff] }
   0xd   :  { %v525_v23 = vld [vmem:[%s601_s2] ss:$0 sm:$0xff]  ;;  %v507_v29 = vld [vmem:[#allocation2 + $0x88] sm:$0xff]  ;;  %v521_v31 = vld [vmem:[#allocation2 + $0xf8] sm:$0xff] }
   0xe   :  { %99 = vmatpush.bf16.msra.mxu0 %v495_v4  ;;  %v506_v30 = vld [vmem:[#allocation2 + $0x80] sm:$0xff]  ;;  %343 = vmatpush.bf16.msra.mxu3 %v521_v31  ;;  %v520_v32 = vld [vmem:[#allocation2 + $0xf0] sm:$0xff]  ;;  %v519_v33 = vld [vmem:[#allocation2 + $0xe8] sm:$0xff] }
   0xf   :  { %181 = vmatpush.bf16.msra.mxu1 %v503_v5  ;;  %262 = vmatpush.bf16.msra.mxu2 %v512_v18  ;;  %v518_v34 = vld [vmem:[#allocation2 + $0xe0] sm:$0xff]  ;;  %v517_v35 = vld [vmem:[#allocation2 + $0xd8] sm:$0xff]  ;;  %v516_v36 = vld [vmem:[#allocation2 + $0xd0] sm:$0xff] }
  0x10   :  { %v526_v37 = vld [vmem:[%s601_s2 + $0x1] ss:$0 sm:$0xff]  ;;  %v515_v43 = vld [vmem:[#allocation2 + $0xc8] sm:$0xff]  ;;  %v527_v45 = vld [vmem:[%s601_s2 + $0x2] ss:$0 sm:$0xff] }
  0x11   :  { %v514_v44 = vld [vmem:[#allocation2 + $0xc0] sm:$0xff] }
  0x12   :  { %100 = vmatpush.bf16.msra.mxu0 %v494_v6  ;;  %344 = vmatpush.bf16.msra.mxu3 %v520_v32  ;;  %v528_v51 = vld [vmem:[%s601_s2 + $0x3] ss:$0 sm:$0xff] }
  0x13   :  { %182 = vmatpush.bf16.msra.mxu1 %v502_v7  ;;  %263 = vmatpush.bf16.msra.mxu2 %v511_v19 }
  0x16   :  { %101 = vmatpush.bf16.msra.mxu0 %v493_v8  ;;  %345 = vmatpush.bf16.msra.mxu3 %v519_v33 }
  0x17   :  { %183 = vmatpush.bf16.msra.mxu1 %v501_v9  ;;  %264 = vmatpush.bf16.msra.mxu2 %v510_v20 }
  0x1a   :  { %102 = vmatpush.bf16.msra.mxu0 %v492_v10  ;;  %346 = vmatpush.bf16.msra.mxu3 %v518_v34 }
  0x1b   :  { %184 = vmatpush.bf16.msra.mxu1 %v500_v11  ;;  %265 = vmatpush.bf16.msra.mxu2 %v509_v21 }
  0x1e   :  { %103 = vmatpush.bf16.msra.mxu0 %v491_v12  ;;  %347 = vmatpush.bf16.msra.mxu3 %v517_v35 }
  0x1f   :  { %185 = vmatpush.bf16.msra.mxu1 %v499_v15  ;;  %266 = vmatpush.bf16.msra.mxu2 %v508_v22 }
  0x22   :  { %104 = vmatpush.bf16.msra.mxu0 %v490_v13  ;;  %348 = vmatpush.bf16.msra.mxu3 %v516_v36 }
  0x23   :  { %186 = vmatpush.bf16.msra.mxu1 %v498_v16  ;;  %267 = vmatpush.bf16.msra.mxu2 %v507_v29 }
  0x25   :  { %105 = vmatmul.bf16.vlgmr.msra.gmra.mxu0 %v30_v14 }
  0x26   :  { %349 = vmatpush.bf16.msra.mxu3 %v515_v43 }
  0x27   :  { %268 = vmatpush.bf16.msra.mxu2 %v506_v30 }
  0x2a   :  { %350 = vmatpush.bf16.msra.mxu3 %v514_v44 }
  0xa2   :  { %v106_v24 = vpop.f32.mrf.mxu0 }
  0xa3   :  { %v107_v25 = vadd.f32 %v525_v23, %v106_v24 }
  0xa5   :  { %v110_v26 = vmax.f32 %v107_v25, 0.0 }
  0xa7   :  { %v111_v27 = vpack.c.bf16 %v110_v26, %v110_v26 }
  0xa9   :  { %187 = vmatmul.bf16.vlgmr.msra.gmra.mxu1 %v111_v27 }
  0xaa   :  { %v108_v28 = vpop.f32.mrf.mxu0 }
 0x126   :  { %v188_v38 = vpop.f32.mrf.mxu1 }
 0x127   :  { %v189_v39 = vadd.f32 %v526_v37, %v188_v38 }
 0x129   :  { %v192_v40 = vmax.f32 %v189_v39, 0.0 }
 0x12b   :  { %v193_v41 = vpack.c.bf16 %v192_v40, %v192_v40 }
 0x12d   :  { %269 = vmatmul.bf16.vlgmr.msra.gmra.mxu2 %v193_v41 }
 0x12e   :  { %v190_v42 = vpop.f32.mrf.mxu1 }
 0x1b0   :  { %v270_v46 = vpop.f32.mrf.mxu2 }
 0x1b1   :  { %v271_v47 = vadd.f32 %v527_v45, %v270_v46 }
 0x1b3   :  { %v274_v48 = vmax.f32 %v271_v47, 0.0 }
 0x1b5   :  { %v275_v49 = vpack.c.bf16 %v274_v48, %v274_v48 }
 0x1b7   :  { %351 = vmatmul.bf16.vlgmr.msra.gmra.mxu3 %v275_v49 }
 0x1b8   :  { %v272_v50 = vpop.f32.mrf.mxu2 }
 0x23a   :  { %v352_v52 = vpop.f32.mrf.mxu3 }
 0x23b   :  { %v353_v53 = vadd.f32 %v528_v51, %v352_v52 }
 0x23d   :  { %356 = vst [vmem:[%s602_s3] sm:$0xff] %v353_v53 }
 0x242   :  { %v354_v54 = vpop.f32.mrf.mxu3 }
 0x243   :  { %361 = vsyncpa [#allocation3], 1 }

</bundles_post_ra>
